<compile_context>
chip_gen: v5e
topology: v5e:2x2
jax: 0.10.0
libtpu: 0.0.40
codegen_flags: <defaults>
</compile_context>

<pallas_src>
import functools

import jax
import jax.numpy as jnp
from jax.experimental import pallas as pl
from jax.experimental.pallas import tpu as pltpu

LANE = 128  # TPU lane width


def _round_up(x, m):
    return ((x + m - 1) // m) * m


def dqn_kernel(x_ref, w1_ref, b1_ref, w2_ref, b2_ref, o_ref):
    # Cast x in-kernel (saves a full wrapper-side HBM read+write pass over x).
    xb = x_ref[...].astype(jnp.bfloat16)
    # fc1: (Bt, N_in) @ (N_in, H) on the MXU, bf16 inputs, f32 accumulate.
    h = jnp.dot(xb, w1_ref[...], preferred_element_type=jnp.float32)
    # Bias + ReLU in f32 (broadcast (1, H) over the batch tile).
    h = jnp.maximum(h + b1_ref[...], 0.0)
    # out: (Bt, H) @ (H, N_out_pad); w2 is lane-dense (padded to 128) in VMEM.
    y = jnp.dot(h.astype(w2_ref.dtype), w2_ref[...],
                preferred_element_type=jnp.float32)
    # Store only the real N_out columns -> un-padded HBM output.
    n_out = o_ref.shape[1]
    o_ref[...] = (y[:, :n_out] + b2_ref[...]).astype(o_ref.dtype)


def prepare_params(w1, b1, w2, b2):
    """One-time (init-time) conversion of parameters to kernel-ready layout.

    w1: (N_in, H), b1: (H,), w2: (H, N_out), b2: (N_out,) in float32.
    w2 is zero-padded to a multiple of 128 columns (lane-dense second matmul
    in VMEM only); the HBM output and b2 stay un-padded. MXU operands -> bf16.
    """
    n_in, h = w1.shape
    n_out = w2.shape[1]
    n_out_pad = max(LANE, _round_up(n_out, LANE))

    w2p = jnp.zeros((h, n_out_pad), jnp.float32).at[:, :n_out].set(w2)

    return {
        "w1": w1.astype(jnp.bfloat16),                 # (N_in, H)
        "b1": b1.reshape(1, h).astype(jnp.float32),    # (1, H)
        "w2": w2p.astype(jnp.bfloat16),                # (H, N_out_pad), VMEM-padded
        "b2": b2.reshape(1, n_out).astype(jnp.float32),  # (1, N_out), un-padded
    }


@functools.partial(jax.jit, static_argnames=("b_tile",))
def dqn_forward(x, params, *, b_tile=2048):
    """x: (B, N_in) float32 (or bf16). Returns (B, N_out) float32."""
    w1, b1, w2, b2 = params["w1"], params["b1"], params["w2"], params["b2"]
    B, n_in = x.shape
    H = w1.shape[1]
    n_out = b2.shape[1]          # real output width (static, from shapes)
    n_out_pad = w2.shape[1]      # VMEM-only padded width

    # Batch tile: multiple of 8 (sublane); aim for >=2 grid steps so the
    # "parallel" axis shards across both TensorCores on v7x. Capped by b_tile.
    bt = min(b_tile, _round_up(pl.cdiv(B, 2), 8))
    bt = max(8, _round_up(bt, 8))
    grid = (pl.cdiv(B, bt),)     # partial edge block is masked by Pallas

    cost = pl.CostEstimate(
        flops=2 * B * (n_in * H + H * n_out_pad),
        transcendentals=0,
        bytes_accessed=(B * n_in * x.dtype.itemsize          # x read
                        + w1.size * 2 + w2.size * 2          # bf16 weights
                        + b1.size * 4 + b2.size * 4          # f32 biases
                        + B * n_out * 4),                    # f32 output write
    )

    out = pl.pallas_call(
        dqn_kernel,
        out_shape=jax.ShapeDtypeStruct((B, n_out), jnp.float32),
        grid=grid,
        in_specs=[
            pl.BlockSpec((bt, n_in), lambda i: (i, 0)),        # x: batch-tiled
            pl.BlockSpec((n_in, H), lambda i: (0, 0)),         # w1: resident
            pl.BlockSpec((1, H), lambda i: (0, 0)),            # b1: resident
            pl.BlockSpec((H, n_out_pad), lambda i: (0, 0)),    # w2: resident
            pl.BlockSpec((1, n_out), lambda i: (0, 0)),        # b2: resident
        ],
        out_specs=pl.BlockSpec((bt, n_out), lambda i: (i, 0)),  # un-padded out
        compiler_params=pltpu.CompilerParams(
            dimension_semantics=("parallel",),   # shard batch tiles across TCs (v7x)
            vmem_limit_bytes=32 * 1024 * 1024,
        ),
        cost_estimate=cost,
    )(x, w1, b1, w2, b2)

    return out


def dqn_ref_f32(x, w1, b1, w2, b2):
    """Pure f32 reference (PyTorch forward semantics)."""
    h = jnp.maximum(x @ w1 + b1, 0.0)
    return h @ w2 + b2


def dqn_ref_bf16(x, w1, b1, w2, b2):
    """Reference matching the kernel's bf16-operand / f32-accumulate numerics."""
    xb = x.astype(jnp.bfloat16)
    w1b = w1.astype(jnp.bfloat16)
    w2b = w2.astype(jnp.bfloat16)
    h = jnp.dot(xb, w1b, preferred_element_type=jnp.float32) + b1
    h = jnp.maximum(h, 0.0)
    y = jnp.dot(h.astype(jnp.bfloat16), w2b, preferred_element_type=jnp.float32)
    return y + b2


if __name__ == "__main__":
    # Shapes implied by the module: x is (batch, N_in), hidden = 128, N_out actions.
    # Batch deliberately not a multiple of the tile to exercise the masked
    # partial-edge-block path.
    B, N_in, H, N_out = 300, 16, 128, 8
    B_TILE = 128  # small tile so the test runs a multi-step grid (grid=(3,))

    key = jax.random.PRNGKey(0)
    kx, kw1, kb1, kw2, kb2 = jax.random.split(key, 5)

    x = jax.random.normal(kx, (B, N_in), dtype=jnp.float32)

    # Deterministic init matching the module's intent:
    # weights ~ N(0, 0.1); biases use PyTorch's default Linear bias init
    # U(-1/sqrt(fan_in), 1/sqrt(fan_in)).
    w1 = 0.1 * jax.random.normal(kw1, (N_in, H), dtype=jnp.float32)
    b1 = jax.random.uniform(
        kb1, (H,), dtype=jnp.float32,
        minval=-1.0 / jnp.sqrt(N_in), maxval=1.0 / jnp.sqrt(N_in))
    w2 = 0.1 * jax.random.normal(kw2, (H, N_out), dtype=jnp.float32)
    b2 = jax.random.uniform(
        kb2, (N_out,), dtype=jnp.float32,
        minval=-1.0 / jnp.sqrt(H), maxval=1.0 / jnp.sqrt(H))

    # One-time parameter prep (VMEM padding / bf16 cast) outside the hot path.
    params = prepare_params(w1, b1, w2, b2)

    out = jax.block_until_ready(dqn_forward(x, params, b_tile=B_TILE))
    assert out.shape == (B, N_out), out.shape
    assert out.dtype == jnp.float32, out.dtype

    # Tight check against a reference with identical bf16/f32 numerics.
    ref_bf16 = dqn_ref_bf16(x, w1, b1.reshape(1, H), w2, b2.reshape(1, N_out))
    assert jnp.allclose(out, ref_bf16, atol=2e-3, rtol=2e-3), \
        float(jnp.max(jnp.abs(out - ref_bf16)))

    # Loose check against the pure-f32 PyTorch-semantics reference (bf16 rounding).
    ref_f32 = dqn_ref_f32(x, w1, b1, w2, b2)
    assert jnp.allclose(out, ref_f32, atol=5e-2, rtol=5e-2), \
        float(jnp.max(jnp.abs(out - ref_f32)))

    # Also exercise the default (single-/two-step) tiling path.
    out2 = jax.block_until_ready(dqn_forward(x, params))
    assert jnp.allclose(out2, out, atol=1e-6, rtol=1e-6)

    print("KERNEL_OK")
</pallas_src>

<mosaic_0001>
module attributes {stable_mosaic.version = 11 : i64} {
  func.func @dqn_kernel(%arg0: i32, %arg1: memref<128x16xf32, #tpu.memory_space<vmem>>, %arg2: memref<16x128xbf16, #tpu.memory_space<vmem>>, %arg3: memref<1x128xf32, #tpu.memory_space<vmem>>, %arg4: memref<128x128xbf16, #tpu.memory_space<vmem>>, %arg5: memref<1x8xf32, #tpu.memory_space<vmem>>, %arg6: memref<128x8xf32, #tpu.memory_space<vmem>>) attributes {dimension_semantics = [#tpu.dimension_semantics<parallel>], iteration_bounds = array<i64: 3>, scalar_prefetch = 0 : i64, scratch_operands = 0 : i64, tpu.core_type = #tpu.core_type<tc>, window_params = [{transform_indices = @transform_0, window_bounds = array<i64: 128, 16>}, {pipeline_mode = #tpu.pipeline_mode<synchronous>, transform_indices = @transform_1, window_bounds = array<i64: 16, 128>}, {pipeline_mode = #tpu.pipeline_mode<synchronous>, transform_indices = @transform_2, window_bounds = array<i64: 1, 128>}, {pipeline_mode = #tpu.pipeline_mode<synchronous>, transform_indices = @transform_3, window_bounds = array<i64: 128, 128>}, {pipeline_mode = #tpu.pipeline_mode<synchronous>, transform_indices = @transform_4, window_bounds = array<i64: 1, 8>}, {transform_indices = @transform_5, window_bounds = array<i64: 128, 8>}]} {
    %c0 = arith.constant 0 : index
    %c0_0 = arith.constant 0 : index
    %0 = vector.load %arg1[%c0, %c0_0] : memref<128x16xf32, #tpu.memory_space<vmem>>, vector<128x16xf32>
    %1 = arith.truncf %0 : vector<128x16xf32> to vector<128x16xbf16>
    %c0_1 = arith.constant 0 : index
    %c0_2 = arith.constant 0 : index
    %2 = vector.load %arg2[%c0_1, %c0_2] : memref<16x128xbf16, #tpu.memory_space<vmem>>, vector<16x128xbf16>
    %cst = arith.constant dense<0.000000e+00> : vector<128x128xf32>
    %3 = tpu.matmul %1, %2, %cst {dimension_numbers = #tpu.dot_dimension_numbers<[1], [0], [0], [1], [0, 0, 1, 1], [], []>} : vector<128x16xbf16>, vector<16x128xbf16>, vector<128x128xf32> -> vector<128x128xf32>
    %c0_3 = arith.constant 0 : index
    %c0_4 = arith.constant 0 : index
    %4 = vector.load %arg3[%c0_3, %c0_4] : memref<1x128xf32, #tpu.memory_space<vmem>>, vector<1x128xf32>
    %5 = vector.broadcast %4 : vector<1x128xf32> to vector<128x128xf32>
    %6 = arith.addf %3, %5 : vector<128x128xf32>
    %cst_5 = arith.constant 0.000000e+00 : f32
    %7 = vector.broadcast %cst_5 : f32 to vector<128x128xf32>
    %8 = arith.maximumf %6, %7 : vector<128x128xf32>
    %9 = arith.truncf %8 : vector<128x128xf32> to vector<128x128xbf16>
    %c0_6 = arith.constant 0 : index
    %c0_7 = arith.constant 0 : index
    %10 = vector.load %arg4[%c0_6, %c0_7] : memref<128x128xbf16, #tpu.memory_space<vmem>>, vector<128x128xbf16>
    %cst_8 = arith.constant dense<0.000000e+00> : vector<128x128xf32>
    %11 = tpu.matmul %9, %10, %cst_8 {dimension_numbers = #tpu.dot_dimension_numbers<[1], [0], [0], [1], [0, 0, 1, 1], [], []>} : vector<128x128xbf16>, vector<128x128xbf16>, vector<128x128xf32> -> vector<128x128xf32>
    %12 = vector.extract_strided_slice %11 {offsets = [0, 0], sizes = [128, 8], strides = [1, 1]} : vector<128x128xf32> to vector<128x8xf32>
    %c0_9 = arith.constant 0 : index
    %c0_10 = arith.constant 0 : index
    %13 = vector.load %arg5[%c0_9, %c0_10] : memref<1x8xf32, #tpu.memory_space<vmem>>, vector<1x8xf32>
    %14 = vector.broadcast %13 : vector<1x8xf32> to vector<128x8xf32>
    %15 = arith.addf %12, %14 : vector<128x8xf32>
    %c0_11 = arith.constant 0 : index
    %c0_12 = arith.constant 0 : index
    %16 = vector.load %arg6[%c0_11, %c0_12] : memref<128x8xf32, #tpu.memory_space<vmem>>, vector<128x8xf32>
    tpu.vector_store %arg6[%c0_11, %c0_12], %15 {strides = array<i32>} : memref<128x8xf32, #tpu.memory_space<vmem>>, vector<128x8xf32>,
    return
  }
  func.func @transform_0(%arg0: i32) -> (i32, i32) {
    %c0_i32 = arith.constant 0 : i32
    %c0_i32_0 = arith.constant 0 : i32
    return %arg0, %c0_i32 : i32, i32
  }
  func.func @transform_1(%arg0: i32) -> (i32, i32) {
    %c0_i32 = arith.constant 0 : i32
    %c0_i32_0 = arith.constant 0 : i32
    %c0_i32_1 = arith.constant 0 : i32
    return %c0_i32, %c0_i32_0 : i32, i32
  }
  func.func @transform_2(%arg0: i32) -> (i32, i32) {
    %c0_i32 = arith.constant 0 : i32
    %c0_i32_0 = arith.constant 0 : i32
    %c0_i32_1 = arith.constant 0 : i32
    return %c0_i32, %c0_i32_0 : i32, i32
  }
  func.func @transform_3(%arg0: i32) -> (i32, i32) {
    %c0_i32 = arith.constant 0 : i32
    %c0_i32_0 = arith.constant 0 : i32
    %c0_i32_1 = arith.constant 0 : i32
    return %c0_i32, %c0_i32_0 : i32, i32
  }
  func.func @transform_4(%arg0: i32) -> (i32, i32) {
    %c0_i32 = arith.constant 0 : i32
    %c0_i32_0 = arith.constant 0 : i32
    %c0_i32_1 = arith.constant 0 : i32
    return %c0_i32, %c0_i32_0 : i32, i32
  }
  func.func @transform_5(%arg0: i32) -> (i32, i32) {
    %c0_i32 = arith.constant 0 : i32
    %c0_i32_0 = arith.constant 0 : i32
    return %arg0, %c0_i32 : i32, i32
  }
}

</mosaic_0001>

<bundles_post_ra>
// kernel: dqn_forward.1
= control target key start
LH: loop header
LB: loop body
LE: loop exit
PB: predicated region body
PF: predicated region fallthrough
CT: control target
= control target key end

     0   :  { %s1104_s18 = smov 0   ;;  %s1106_s19 = smov 0   ;;  %s1339_s0 = inlined_call_operand.vmem [shape: f32[300,16], index: 0, kind: input, shape index: {}]   ;;  %s1340_s1 = inlined_call_operand.vmem [shape: bf16[16,128], index: 1, kind: input, shape index: {}]   ;;  %s1341_s2 = inlined_call_operand.vmem [shape: f32[1,128], index: 2, kind: input, shape index: {}]   ;;  %s1342_s3 = inlined_call_operand.vmem [shape: bf16[128,128], index: 3, kind: input, shape index: {}]   ;;  %s1343_s4 = inlined_call_operand.vmem [shape: f32[1,8], index: 4, kind: input, shape index: {}]   ;;  %s1344_s5 = inlined_call_operand.vmem [shape: f32[300,8], index: 5, kind: output, shape index: {}]  }
   0x1   :  { %s1108_s20 = smov 0  }
   0x2 LB: > { %s1117_s21 = sadd.s32 4294967295, %s1040_s20   ;;  %s1119_s22 = sadd.s32 1, %s1040_s20   ;;  %s1040_s20 = sphi %s1108_s20, %s1353_s20   ;;  %s1036_s19 = sphi %s1106_s19, %s1352_s19   ;;  %s1032_s18 = sphi %s1104_s18, %s1351_s18  }
   0x3   : > { %s129_s23 = ssub.s32 %s1040_s20, %s1119_s22  ;;  %s132_s24 = sadd.s32 1, %s1036_s19 }
   0x4   : > { %p130_p0 = scmp.eq.s32.totalorder %s129_s23, 0  ;;  %p142_p1 = scmp.ne.s32.totalorder %s1036_s19, %s1032_s18 }
   0x5   : > { %p143_p2 = scmp.eq.s32.totalorder %s1117_s21, 2  ;;  %p810_p3 = scmp.ge.s32.totalorder %s1040_s20, 1 }
   0x6   : > { %s1127_s25 = scalar_select %p130_p0, %s1036_s19, %s132_s24  }
   0x7   : > { %p1129_p4 = por %p143_p2, %p142_p1  ;;  %p196_p5 = scmp.lt.s32.totalorder %s1040_s20, 4 }
   0x9   : > { %p197_p6 = pnand %p810_p3, %p196_p5 }
   0xa   : > { %s1137_s29 = sshll.u32 (!%p197_p6), %s1117_s21, 4  ;;  %s224_s10 = sand.u32 (!%p197_p6), 1, %s1032_s18  }
   0xb   : > { %200 = sbr.rel (%p197_p6) target bundleno = 466 (0x1d2), region = 40  ;;  %p232_p7 = scmp.lt.s32.totalorder (!%p197_p6), %s1137_s29, 37 }
   0xc   : > { %s811_s11 = sshll.u32 (!%p197_p6), %s224_s10, 7 }
   0xd   : > { %s1201_s14 = scalar_lea.vmem (!%p197_p6), [#allocation2], %s811_s11  }
  0x10   : > { %v875_v0 = vld [vmem:[%s1340_s1] sm:$0xff]  ;;  %s233_s30 = scalar_select %p232_p7, %s1137_s29, 37  ;;  %vm283_vm0 = vcmask 130048   ;;  %v883_v13 = vld [vmem:[%s1342_s3 + $0x38] sm:$0xff]  ;;  %v882_v14 = vld [vmem:[%s1342_s3 + $0x30] sm:$0xff]  ;;  %vm514_vm1 = vcmask 64512  }
  0x11   : > { %315 = vmatpush.bf16.msra.mxu0 %v875_v0  ;;  %887 = vmatpush.bf16.msra.mxu3 %v875_v0  ;;  %v881_v15 = vld [vmem:[%s1342_s3 + $0x28] sm:$0xff]  ;;  %v880_v21 = vld [vmem:[%s1342_s3 + $0x20] sm:$0xff]  ;;  %v879_v29 = vld [vmem:[%s1342_s3 + $0x18] sm:$0xff]  ;;  %s539_s18 = ssub.s32 (%p1129_p4), 38, %s1137_s29  ;;  %s884_s15 = sshll.u32 (%p1129_p4), %s1117_s21, 7 }
  0x12   : > { %s813_s6 = sshll.u32 %s233_s30, 3  ;;  %445 = vmatpush.bf16.msra.mxu1 %v883_v13  ;;  %888 = vmatpush.bf16.msra.mxu2 %v883_v13  ;;  %v878_v30 = vld [vmem:[%s1342_s3 + $0x10] sm:$0xff]  ;;  %v877_v31 = vld [vmem:[%s1342_s3 + $0x8] sm:$0xff]  ;;  %v876_v32 = vld [vmem:[%s1342_s3] sm:$0xff]  ;;  %p540_p8 = scmp.lt.s32.totalorder (%p1129_p4), %s539_s18, 16 }
  0x13   : > { %s1144_s9 = scalar_lea.vmem %s1339_s0, %s813_s6  ;;  %v984_v34 = vld [vmem:[%s1341_s2] ss:$0 sm:$0xff]  ;;  %s1242_s20 = scalar_lea.vmem (%p1129_p4), %s1344_s5, %s884_s15  }
  0x14   : > { %v247_v1 = vld [vmem:[%s1144_s9] sm:$0xff]  ;;  %v248_v2 = vld [vmem:[%s1144_s9 + $0x8] sm:$0xff]  ;;  %v249_v4 = vld [vmem:[%s1144_s9 + $0x10] sm:$0xff] }
  0x15   : > { %v263_v3 = vpack.c.bf16 %v248_v2, %v247_v1  ;;  %v250_v5 = vld [vmem:[%s1144_s9 + $0x18] sm:$0xff]  ;;  %v251_v7 = vld [vmem:[%s1144_s9 + $0x20] sm:$0xff]  ;;  %v252_v8 = vld [vmem:[%s1144_s9 + $0x28] sm:$0xff] }
  0x16   : > { %v264_v6 = vpack.c.bf16 %v250_v5, %v249_v4  ;;  %v265_v9 = vpack.c.bf16 %v252_v8, %v251_v7  ;;  %v257_v10 = vld [vmem:[%s1144_s9 + $0x50] sm:$0xff]  ;;  %v258_v11 = vld [vmem:[%s1144_s9 + $0x58] sm:$0xff]  ;;  %446 = vmatpush.bf16.msra.mxu1 %v882_v14  ;;  %889 = vmatpush.bf16.msra.mxu2 %v882_v14  ;;  %v259_v18 = vld [vmem:[%s1144_s9 + $0x60] sm:$0xff] }
  0x17   : > { %818 = vmatmul.msk.bf16.vlgmr.msra.gmra.mxu0 %vm283_vm0, %v263_v3  ;;  %v268_v12 = vpack.c.bf16 %v258_v11, %v257_v10  ;;  %v253_v16 = vld [vmem:[%s1144_s9 + $0x30] sm:$0xff]  ;;  %v254_v17 = vld [vmem:[%s1144_s9 + $0x38] sm:$0xff]  ;;  %v260_v19 = vld [vmem:[%s1144_s9 + $0x68] sm:$0xff] }
  0x18   : > { %v266_v20 = vpack.c.bf16 %v254_v17, %v253_v16  ;;  %v269_v22 = vpack.c.bf16 %v260_v19, %v259_v18  ;;  %v255_v23 = vld [vmem:[%s1144_s9 + $0x40] sm:$0xff]  ;;  %v256_v24 = vld [vmem:[%s1144_s9 + $0x48] sm:$0xff]  ;;  %v261_v25 = vld [vmem:[%s1144_s9 + $0x70] sm:$0xff] }
  0x19   : > { %823 = vmatmul.msk.bf16.vlgmr.msra.gmra.mxu3 %vm283_vm0, %v268_v12  ;;  %v262_v26 = vld [vmem:[%s1144_s9 + $0x78] sm:$0xff]  ;;  %v267_v27 = vpack.c.bf16 %v256_v24, %v255_v23 }
  0x1a   : > { %447 = vmatpush.bf16.msra.mxu1 %v881_v15  ;;  %890 = vmatpush.bf16.msra.mxu2 %v881_v15  ;;  %v270_v28 = vpack.c.bf16 %v262_v26, %v261_v25  ;;  %v985_v26 = vld [vmem:[%s1343_s4] ss:$0 sm:$0xff] }
  0x1e   : > { %448 = vmatpush.bf16.msra.mxu1 %v880_v21  ;;  %891 = vmatpush.bf16.msra.mxu2 %v880_v21 }
  0x22   : > { %449 = vmatpush.bf16.msra.mxu1 %v879_v29  ;;  %892 = vmatpush.bf16.msra.mxu2 %v879_v29 }
  0x26   : > { %450 = vmatpush.bf16.msra.mxu1 %v878_v30  ;;  %893 = vmatpush.bf16.msra.mxu2 %v878_v30 }
  0x27   : > { %819 = vmatmul.msk.bf16.gmra.mxu0 %vm283_vm0, %v264_v6 }
  0x29   : > { %824 = vmatmul.msk.bf16.gmra.mxu3 %vm283_vm0, %v269_v22 }
  0x2a   : > { %451 = vmatpush.bf16.msra.mxu1 %v877_v31  ;;  %894 = vmatpush.bf16.msra.mxu2 %v877_v31 }
  0x2e   : > { %452 = vmatpush.bf16.msra.mxu1 %v876_v32  ;;  %895 = vmatpush.bf16.msra.mxu2 %v876_v32 }
  0x37   : > { %820 = vmatmul.msk.bf16.gmra.mxu0 %vm283_vm0, %v265_v9 }
  0x39   : > { %825 = vmatmul.msk.bf16.gmra.mxu3 %vm283_vm0, %v270_v28 }
  0x47   : > { %821 = vmatmul.msk.bf16.gmra.mxu0 %vm283_vm0, %v266_v20 }
  0x57   : > { %822 = vmatmul.msk.bf16.gmra.mxu0 %vm283_vm0, %v267_v27 }
  0x94   : > { %v317_v33 = vpop.f32.mrf.mxu0 }
  0x95   : > { %v318_v35 = vadd.f32 %v984_v34, %v317_v33 }
  0x97   : > { %v357_v38 = vmax.f32 %v318_v35, 0.0 }
  0x9c   : > { %v319_v36 = vpop.f32.mrf.mxu0  ;;  %v342_v63 = vpop.f32.mrf.mxu3 }
  0x9d   : > { %v320_v37 = vadd.f32 %v984_v34, %v319_v36  ;;  %v343_v8 = vadd.f32 %v984_v34, %v342_v63 }
  0x9f   : > { %v358_v39 = vmax.f32 %v320_v37, 0.0  ;;  %v367_v10 = vmax.f32 %v343_v8, 0.0 }
  0xa1   : > { %v373_v40 = vpack.c.bf16 %v358_v39, %v357_v38 }
  0xa3   : > { %453 = vmatmul.bf16.vlgmr.msra.gmra.mxu1 %v373_v40 }
  0xa4   : > { %v322_v41 = vpop.f32.mrf.mxu0  ;;  %v344_v3 = vpop.f32.mrf.mxu3 }
  0xa5   : > { %v323_v42 = vadd.f32 %v984_v34, %v322_v41  ;;  %v345_v9 = vadd.f32 %v984_v34, %v344_v3 }
  0xa7   : > { %v359_v45 = vmax.f32 %v323_v42, 0.0  ;;  %v368_v11 = vmax.f32 %v345_v9, 0.0 }
  0xa9   : > { %v378_v12 = vpack.c.bf16 %v368_v11, %v367_v10 }
  0xac   : > { %v324_v43 = vpop.f32.mrf.mxu0  ;;  %v347_v7 = vpop.f32.mrf.mxu3 }
  0xad   : > { %v325_v44 = vadd.f32 %v984_v34, %v324_v43  ;;  %v348_v14 = vadd.f32 %v984_v34, %v347_v7 }
  0xaf   : > { %v360_v46 = vmax.f32 %v325_v44, 0.0  ;;  %v369_v17 = vmax.f32 %v348_v14, 0.0 }
  0xb1   : > { %v374_v47 = vpack.c.bf16 %v360_v46, %v359_v45 }
  0xb3   : > { %458 = vmatmul.bf16.gmra.mxu1 %v374_v47 }
  0xb4   : > { %v327_v48 = vpop.f32.mrf.mxu0  ;;  %v349_v13 = vpop.f32.mrf.mxu3 }
  0xb5   : > { %v328_v49 = vadd.f32 %v984_v34, %v327_v48  ;;  %v350_v15 = vadd.f32 %v984_v34, %v349_v13 }
  0xb7   : > { %v361_v52 = vmax.f32 %v328_v49, 0.0  ;;  %v370_v18 = vmax.f32 %v350_v15, 0.0 }
  0xb9   : > { %v379_v19 = vpack.c.bf16 %v370_v18, %v369_v17 }
  0xbc   : > { %v329_v50 = vpop.f32.mrf.mxu0  ;;  %v352_v16 = vpop.f32.mrf.mxu3 }
  0xbd   : > { %v330_v51 = vadd.f32 %v984_v34, %v329_v50  ;;  %v353_v21 = vadd.f32 %v984_v34, %v352_v16 }
  0xbf   : > { %v362_v53 = vmax.f32 %v330_v51, 0.0  ;;  %v371_v23 = vmax.f32 %v353_v21, 0.0 }
  0xc1   : > { %v375_v54 = vpack.c.bf16 %v362_v53, %v361_v52 }
  0xc3   : > { %463 = vmatmul.bf16.gmra.mxu1 %v375_v54 }
  0xc4   : > { %v332_v55 = vpop.f32.mrf.mxu0  ;;  %v354_v20 = vpop.f32.mrf.mxu3 }
  0xc5   : > { %v333_v56 = vadd.f32 %v984_v34, %v332_v55  ;;  %v355_v22 = vadd.f32 %v984_v34, %v354_v20 }
  0xc7   : > { %v363_v59 = vmax.f32 %v333_v56, 0.0  ;;  %v372_v24 = vmax.f32 %v355_v22, 0.0 }
  0xc9   : > { %v380_v25 = vpack.c.bf16 %v372_v24, %v371_v23 }
  0xcc   : > { %v334_v57 = vpop.f32.mrf.mxu0 }
  0xcd   : > { %v335_v58 = vadd.f32 %v984_v34, %v334_v57 }
  0xcf   : > { %v364_v60 = vmax.f32 %v335_v58, 0.0 }
  0xd1   : > { %v376_v61 = vpack.c.bf16 %v364_v60, %v363_v59 }
  0xd3   : > { %468 = vmatmul.bf16.gmra.mxu1 %v376_v61 }
  0xd4   : > { %v337_v62 = vpop.f32.mrf.mxu0 }
  0xd5   : > { %v338_v0 = vadd.f32 %v984_v34, %v337_v62 }
  0xd7   : > { %v365_v4 = vmax.f32 %v338_v0, 0.0 }
  0xdc   : > { %v339_v1 = vpop.f32.mrf.mxu0 }
  0xdd   : > { %v340_v2 = vadd.f32 %v984_v34, %v339_v1 }
  0xdf   : > { %v366_v5 = vmax.f32 %v340_v2, 0.0 }
  0xe1   : > { %v377_v6 = vpack.c.bf16 %v366_v5, %v365_v4 }
  0xe3   : > { %473 = vmatmul.bf16.vlgmr.msra.gmra.mxu2 %v377_v6 }
  0xf3   : > { %478 = vmatmul.bf16.gmra.mxu2 %v378_v12 }
 0x103   : > { %483 = vmatmul.bf16.gmra.mxu2 %v379_v19 }
 0x113   : > { %488 = vmatmul.bf16.gmra.mxu2 %v380_v25 }
 0x120   : > { %v454_v27 = vpop.f32.mrf.mxu1 }
 0x121   : > { %v498_v28 = vadd.f32 %v985_v26, %v454_v27 }
 0x123   : > { %515 = vst.msk [vmem:[%s1201_s14] sm:$0xff] %vm514_vm1, %v498_v28 }
 0x128   : > { %v456_v29 = vpop.f32.mrf.mxu1 }
 0x129   : > { %v499_v30 = vadd.f32 %v985_v26, %v456_v29 }
 0x12b   : > { %516 = vst.msk [vmem:[%s1201_s14 + $0x8] sm:$0xff] %vm514_vm1, %v499_v30 }
 0x130   : > { %v459_v31 = vpop.f32.mrf.mxu1 }
 0x131   : > { %v500_v32 = vadd.f32 %v985_v26, %v459_v31 }
 0x133   : > { %517 = vst.msk [vmem:[%s1201_s14 + $0x10] sm:$0xff] %vm514_vm1, %v500_v32 }
 0x138   : > { %v461_v33 = vpop.f32.mrf.mxu1 }
 0x139   : > { %v501_v34 = vadd.f32 %v985_v26, %v461_v33 }
 0x13b   : > { %518 = vst.msk [vmem:[%s1201_s14 + $0x18] sm:$0xff] %vm514_vm1, %v501_v34 }
 0x140   : > { %v464_v35 = vpop.f32.mrf.mxu1 }
 0x141   : > { %v502_v36 = vadd.f32 %v985_v26, %v464_v35 }
 0x143   : > { %519 = vst.msk [vmem:[%s1201_s14 + $0x20] sm:$0xff] %vm514_vm1, %v502_v36 }
 0x148   : > { %v466_v37 = vpop.f32.mrf.mxu1 }
 0x149   : > { %v503_v38 = vadd.f32 %v985_v26, %v466_v37 }
 0x14b   : > { %520 = vst.msk [vmem:[%s1201_s14 + $0x28] sm:$0xff] %vm514_vm1, %v503_v38 }
 0x150   : > { %v469_v39 = vpop.f32.mrf.mxu1 }
 0x151   : > { %v504_v40 = vadd.f32 %v985_v26, %v469_v39 }
 0x153   : > { %521 = vst.msk [vmem:[%s1201_s14 + $0x30] sm:$0xff] %vm514_vm1, %v504_v40 }
 0x158   : > { %v471_v41 = vpop.f32.mrf.mxu1 }
 0x159   : > { %v505_v42 = vadd.f32 %v985_v26, %v471_v41 }
 0x15b   : > { %522 = vst.msk [vmem:[%s1201_s14 + $0x38] sm:$0xff] %vm514_vm1, %v505_v42 }
 0x166   : > { %v474_v43 = vpop.f32.mrf.mxu2 }
 0x167   : > { %v506_v44 = vadd.f32 %v985_v26, %v474_v43 }
 0x169   : > { %523 = vst.msk [vmem:[%s1201_s14 + $0x40] sm:$0xff] %vm514_vm1, %v506_v44 }
 0x16e   : > { %v476_v45 = vpop.f32.mrf.mxu2 }
 0x16f   : > { %v507_v46 = vadd.f32 %v985_v26, %v476_v45 }
 0x171   : > { %524 = vst.msk [vmem:[%s1201_s14 + $0x48] sm:$0xff] %vm514_vm1, %v507_v46 }
 0x176   : > { %v479_v47 = vpop.f32.mrf.mxu2 }
 0x177   : > { %v508_v48 = vadd.f32 %v985_v26, %v479_v47 }
 0x179   : > { %525 = vst.msk [vmem:[%s1201_s14 + $0x50] sm:$0xff] %vm514_vm1, %v508_v48 }
 0x17e   : > { %v481_v49 = vpop.f32.mrf.mxu2 }
 0x17f   : > { %v509_v50 = vadd.f32 %v985_v26, %v481_v49 }
 0x181   : > { %526 = vst.msk [vmem:[%s1201_s14 + $0x58] sm:$0xff] %vm514_vm1, %v509_v50 }
 0x186   : > { %v484_v51 = vpop.f32.mrf.mxu2 }
 0x187   : > { %v510_v52 = vadd.f32 %v985_v26, %v484_v51 }
 0x189   : > { %527 = vst.msk [vmem:[%s1201_s14 + $0x60] sm:$0xff] %vm514_vm1, %v510_v52 }
 0x18e   : > { %v486_v53 = vpop.f32.mrf.mxu2 }
 0x18f   : > { %v511_v54 = vadd.f32 %v985_v26, %v486_v53 }
 0x191   : > { %528 = vst.msk [vmem:[%s1201_s14 + $0x68] sm:$0xff] %vm514_vm1, %v511_v54 }
 0x196   : > { %v489_v55 = vpop.f32.mrf.mxu2 }
 0x197   : > { %v512_v56 = vadd.f32 %v985_v26, %v489_v55 }
 0x199   : > { %529 = vst.msk [vmem:[%s1201_s14 + $0x70] sm:$0xff] %vm514_vm1, %v512_v56 }
 0x19d   : > { %537 = sbr.rel (!%p1129_p4) target bundleno = 466 (0x1d2), region = 44 }
 0x19e   : > { %v491_v57 = vpop.f32.mrf.mxu2 }
 0x19f   : > { %v513_v58 = vadd.f32 %v985_v26, %v491_v57 }
 0x1a1   : > { %530 = vst.msk [vmem:[%s1201_s14 + $0x78] sm:$0xff] %vm514_vm1, %v513_v58 }
 0x1a2   : > { %s1355_s18 = smov (!%p540_p8, %s539_s18), 16 }
 0x1a3   : > { %s860_s23 = sshll.u32 %s1355_s18, 3 }
 0x1a4   : > { %p863_p9 = scmp.eq.s32.totalorder %s860_s23, 0 }
 0x1a5   : > { %s1248_s24 = sshrl.u32 (!%p863_p9), %s1355_s18, 4 }
 0x1a6   : > { %548 = sbr.rel (%p863_p9) target bundleno = 466 (0x1d2), region = 48  ;;  %p864_p10 = scmp.le.s32.totalorder (!%p863_p9), %s1248_s24, 0 }
 0x1ab   : > { %763 = sbr.rel (%p864_p10) target bundleno = 449 (0x1c1), region = 124  ;;  %s1346_s21 = smov (!%p864_p10), %s1242_s20 }
 0x1ac   : > { %s1347_s26 = smov (!%p864_p10), %s1201_s14  ;;  %s1257_s29 = smov (!%p864_p10), 0  }
 0x1ad   : > { %s1259_s27 = smov (!%p864_p10), 0  }
 0x1b0 LB: >> { %v641_v59 = vld [vmem:[%s1048_s26] sm:$0xff]  ;;  %v643_v60 = vld [vmem:[%s1048_s26 + $0x8] sm:$0xff]  ;;  %v645_v61 = vld [vmem:[%s1048_s26 + $0x10] sm:$0xff]  ;;  %s673_s28 = sadd.s32 1, %s1052_s29  ;;  %s635_s27 = sadd.s32 1, %s1056_s27   ;;  %s1056_s27 = sphi %s1259_s27, %s635_s27   ;;  %s1052_s29 = sphi %s1257_s29, %s1350_s29   ;;  %s1048_s26 = sphi %s1347_s26, %s1349_s26   ;;  %s1044_s21 = sphi %s1346_s21, %s1348_s21  }
 0x1b1   : >> { %642 = vst [vmem:[%s1044_s21] sm:$0xff] %v641_v59  ;;  %v647_v62 = vld [vmem:[%s1048_s26 + $0x18] sm:$0xff]  ;;  %p674_p11 = scmp.ge.s32.totalorder %s673_s28, %s1248_s24  ;;  %v649_v63 = vld [vmem:[%s1048_s26 + $0x20] sm:$0xff]  ;;  %v651_v0 = vld [vmem:[%s1048_s26 + $0x28] sm:$0xff]  ;;  %p634_p12 = scmp.ge.s32.totalorder %s635_s27, %s1248_s24 }
 0x1b2   : >> { %644 = vst [vmem:[%s1044_s21 + $0x8] sm:$0xff] %v643_v60  ;;  %v653_v1 = vld [vmem:[%s1048_s26 + $0x30] sm:$0xff]  ;;  %v655_v2 = vld [vmem:[%s1048_s26 + $0x38] sm:$0xff]  ;;  %v657_v3 = vld [vmem:[%s1048_s26 + $0x40] sm:$0xff] }
 0x1b3   : >> { %646 = vst [vmem:[%s1044_s21 + $0x10] sm:$0xff] %v645_v61  ;;  %s1357_s28 = smov (%p674_p11, %s673_s28), 0  ;;  %v659_v4 = vld [vmem:[%s1048_s26 + $0x48] sm:$0xff]  ;;  %v661_v5 = vld [vmem:[%s1048_s26 + $0x50] sm:$0xff]  ;;  %v663_v6 = vld [vmem:[%s1048_s26 + $0x58] sm:$0xff] }
 0x1b4   : >> { %648 = vst [vmem:[%s1044_s21 + $0x18] sm:$0xff] %v647_v62  ;;  %s865_s30 = sshll.u32 %s1357_s28, 7  ;;  %v665_v7 = vld [vmem:[%s1048_s26 + $0x60] sm:$0xff]  ;;  %v667_v8 = vld [vmem:[%s1048_s26 + $0x68] sm:$0xff]  ;;  %v669_v9 = vld [vmem:[%s1048_s26 + $0x70] sm:$0xff]  ;;  %s1350_s29 = smov %s1357_s28 }
 0x1b5   : >> { %650 = vst [vmem:[%s1044_s21 + $0x20] sm:$0xff] %v649_v63  ;;  %s678_s6 = scalar_lea.vmem %s1201_s14, %s865_s30 [#allocation2]   ;;  %s679_s7 = scalar_lea.vmem %s1242_s20, %s865_s30   ;;  %v671_v10 = vld [vmem:[%s1048_s26 + $0x78] sm:$0xff] }
 0x1b6   : >> { %652 = vst [vmem:[%s1044_s21 + $0x28] sm:$0xff] %v651_v0  ;;  %s1349_s26 = smov %s678_s6 }
 0x1b7   : >> { %654 = vst [vmem:[%s1044_s21 + $0x30] sm:$0xff] %v653_v1 }
 0x1b8   : >> { %656 = vst [vmem:[%s1044_s21 + $0x38] sm:$0xff] %v655_v2 }
 0x1b9   : >> { %658 = vst [vmem:[%s1044_s21 + $0x40] sm:$0xff] %v657_v3 }
 0x1ba   : >> { %660 = vst [vmem:[%s1044_s21 + $0x48] sm:$0xff] %v659_v4 }
 0x1bb   : >> { %662 = vst [vmem:[%s1044_s21 + $0x50] sm:$0xff] %v661_v5 }
 0x1bc   : >> { %664 = vst [vmem:[%s1044_s21 + $0x58] sm:$0xff] %v663_v6  ;;  %637 = sbr.rel (!%p634_p12) target bundleno = 432 (0x1b0), region = 130 }
 0x1bd   : >> { %666 = vst [vmem:[%s1044_s21 + $0x60] sm:$0xff] %v665_v7 }
 0x1be   : >> { %668 = vst [vmem:[%s1044_s21 + $0x68] sm:$0xff] %v667_v8 }
 0x1bf   : >> { %670 = vst [vmem:[%s1044_s21 + $0x70] sm:$0xff] %v669_v9 }
 0x1c0   : >> { %672 = vst [vmem:[%s1044_s21 + $0x78] sm:$0xff] %v671_v10  ;;  %s1348_s21 = smov %s679_s7 }
 0x1c1 PF: > { %s1321_s8 = sand.u32 15, %s1355_s18   ;;  %s885_s9 = sshll.u32 %s1248_s24, 7 }
 0x1c2   : > { %s684_s10 = scalar_lea.vmem %s1201_s14, %s885_s9 [#allocation2]   ;;  %s686_s11 = scalar_lea.vmem %s1242_s20, %s885_s9  }
 0x1c3   : > { %p870_p13 = scmp.le.s32.totalorder %s1321_s8, 0 }
 0x1c4   : > { %s1058_s12 = smov (!%p870_p13), %s686_s11   ;;  %s1062_s13 = smov (!%p870_p13), %s684_s10  }
 0x1c5   : > { %777 = sbr.rel (%p870_p13) target bundleno = 466 (0x1d2), region = 135  ;;  %s1066_s15 = smov (!%p870_p13), 0  }
 0x1c6   : > { %s1070_s16 = smov (!%p870_p13), 0  }
 0x1ca LB: >> { %v696_v11 = vld [vmem:[%s1064_s13] sm:$0xff]  ;;  %s698_s18 = sadd.s32 1, %s1068_s15  ;;  %s690_s16 = sadd.s32 1, %s1072_s16   ;;  %s1072_s16 = sphi %s1070_s16, %s690_s16   ;;  %s1068_s15 = sphi %s1066_s15, %s1067_s15   ;;  %s1064_s13 = sphi %s1062_s13, %s703_s13   ;;  %s1060_s12 = sphi %s1058_s12, %s704_s12  }
 0x1cb   : >> { %697 = vst [vmem:[%s1060_s12] sm:$0xff] %v696_v11  ;;  %p699_p0 = scmp.ge.s32.totalorder %s698_s18, %s1321_s8  ;;  %p689_p1 = scmp.ge.s32.totalorder %s690_s16, %s1321_s8 }
 0x1cd   : >> { %s1359_s18 = smov (%p699_p0, %s698_s18), 0  ;;  %692 = sbr.rel (!%p689_p1) target bundleno = 458 (0x1ca), region = 141 }
 0x1ce   : >> { %s871_s14 = sshll.u32 %s1359_s18, 3  ;;  %s1067_s15 = smov %s1359_s18  }
 0x1cf   : >> { %s703_s13 = scalar_lea.vmem %s684_s10, %s871_s14 [#allocation2]   ;;  %s704_s12 = scalar_lea.vmem %s686_s11, %s871_s14  }
 0x1d2 PF: > { %p12_p2 = scmp.ge.s32.totalorder %s1119_s22, 5   ;;  %s1351_s18 = smov %s1036_s19 }
 0x1d3   : > { %s1352_s19 = smov %s1127_s25  ;;  %s1353_s20 = smov %s1119_s22 }
 0x1d4   :  { %14 = sbr.rel (!%p12_p2) target bundleno = 2 (0x2), region = 152 }

</bundles_post_ra>
